<compile_context>
chip_gen: v6e
topology: v6e:2x2x1
jax: 0.10.0
libtpu: 0.0.40
codegen_flags: <defaults>
</compile_context>

<pallas_src>
import jax
import jax.numpy as jnp
from jax.experimental import pallas as pl
from jax.experimental.pallas import tpu as pltpu

IN_FEATURES = 1024
LANES = 128
SUBLANES = 8


def _round_up(x, m):
    return ((x + m - 1) // m) * m


def _linear_kernel(x_ref, wT_ref, b_ref, o_ref):
    # x_ref: (TB, 1024) stream dtype, wT_ref: (1024, N_pad) stream dtype,
    # b_ref: (1, N_pad) f32, o_ref: (TB, N_pad) out dtype.
    acc = jnp.dot(x_ref[...], wT_ref[...], preferred_element_type=jnp.float32)
    o_ref[...] = (acc + b_ref[...]).astype(o_ref.dtype)


def prepare_fc_params(weight, bias, *, stream_dtype=jnp.bfloat16):
    """One-time param prep: transpose + zero-pad classes to a lane-dense width."""
    num_class, in_features = weight.shape
    n_pad = max(LANES, _round_up(num_class, LANES))
    wT = jnp.zeros((in_features, n_pad), dtype=stream_dtype)
    wT = wT.at[:, :num_class].set(weight.T.astype(stream_dtype))
    # Bias stays f32: it is added to the f32 accumulator inside the kernel.
    b2 = jnp.zeros((1, n_pad), dtype=jnp.float32)
    b2 = b2.at[:, :num_class].set(bias.astype(jnp.float32))
    return wT, b2, num_class


def dens_net_fc_forward(x_nchw, wT, b2, num_class, *, batch_tile=1024,
                        stream_dtype=jnp.bfloat16, out_dtype=None):
    """Forward of densNetFC: flatten (C,H,W) -> 1024, then Linear(1024, numClass).

    x_nchw: (B, C, H, W) with C*H*W == 1024
    wT:     (1024, N_pad) pre-transposed / pre-padded weight (stream dtype)
    b2:     (1, N_pad) pre-padded f32 bias
    returns (B, numClass) in out_dtype (defaults to x dtype)
    """
    B = x_nchw.shape[0]
    in_features, n_pad = wT.shape
    if out_dtype is None:
        out_dtype = x_nchw.dtype

    # nn.Flatten order (C, H, W); cast to the streaming dtype (HBM-BW bound).
    x_flat = x_nchw.reshape(B, -1).astype(stream_dtype)
    assert x_flat.shape[1] == in_features, "flattened features must equal 1024"

    # Batch tile: multiple of 8 sublanes; no HBM padding of x — Pallas masks
    # the ragged last block.  When B > 8, cap the tile at ceil(B/2) (rounded up
    # to 8) so there are >= 2 grid steps and the "parallel" axis can shard
    # across v7x's two TensorCores.
    if B > SUBLANES:
        tb = min(batch_tile, _round_up(pl.cdiv(B, 2), SUBLANES))
    else:
        tb = min(batch_tile, _round_up(B, SUBLANES))
    grid = (pl.cdiv(B, tb),)

    out = pl.pallas_call(
        _linear_kernel,
        out_shape=jax.ShapeDtypeStruct((B, n_pad), out_dtype),
        grid=grid,
        in_specs=[
            # Streamed x tile: auto double-buffered by the pipeline.
            pl.BlockSpec((tb, in_features), lambda i: (i, 0)),
            # Constant-index weight / bias: single-buffered (VMEM-resident).
            pl.BlockSpec((in_features, n_pad), lambda i: (0, 0),
                         pipeline_mode=pl.Buffered(1)),
            pl.BlockSpec((1, n_pad), lambda i: (0, 0),
                         pipeline_mode=pl.Buffered(1)),
        ],
        out_specs=pl.BlockSpec((tb, n_pad), lambda i: (i, 0)),
        compiler_params=pltpu.CompilerParams(
            dimension_semantics=("parallel",),
        ),
    )(x_flat, wT, b2)

    # Drop the zero-padded class lanes.
    return out[:, :num_class]


def make_dens_net_fc(weight, bias, *, stream_dtype=jnp.bfloat16, batch_tile=1024):
    """Module-like constructor: prep params once, return a jitted forward."""
    wT, b2, num_class = prepare_fc_params(weight, bias, stream_dtype=stream_dtype)

    @jax.jit
    def forward(x_nchw):
        return dens_net_fc_forward(x_nchw, wT, b2, num_class,
                                   batch_tile=batch_tile,
                                   stream_dtype=stream_dtype)

    return forward


if __name__ == "__main__":
    num_class = 10
    B, C, H, W = 2, 4, 16, 16  # C*H*W = 1024, matching nn.Linear(1024, numClass)

    key = jax.random.PRNGKey(0)
    kx, kw, kb = jax.random.split(key, 3)

    x = jax.random.normal(kx, (B, C, H, W), dtype=jnp.float32)

    # Deterministic parameter init (PyTorch-style uniform bounds for Linear).
    in_features = C * H * W
    bound = 1.0 / (in_features ** 0.5)
    weight = jax.random.uniform(kw, (num_class, in_features),
                                minval=-bound, maxval=bound, dtype=jnp.float32)
    bias = jax.random.uniform(kb, (num_class,),
                              minval=-bound, maxval=bound, dtype=jnp.float32)

    # Reference in plain JAX (f32).
    y_ref = x.reshape(B, -1) @ weight.T + bias

    # Default bf16-streaming path (production config): relaxed tolerance.
    fwd_bf16 = make_dens_net_fc(weight, bias)              # stream_dtype=bf16
    y_bf16 = jax.block_until_ready(fwd_bf16(x))
    assert y_bf16.shape == (B, num_class)
    assert jnp.allclose(y_bf16, y_ref, atol=2e-2, rtol=2e-2)

    # f32-streaming path: bit-accuracy check against the reference.
    fwd_f32 = make_dens_net_fc(weight, bias, stream_dtype=jnp.float32)
    y_f32 = jax.block_until_ready(fwd_f32(x))
    assert y_f32.shape == (B, num_class)
    assert jnp.allclose(y_f32, y_ref, atol=1e-5, rtol=1e-5)

    print("KERNEL_OK")
</pallas_src>

<mosaic_0001>
module attributes {stable_mosaic.version = 11 : i64} {
  func.func @_linear_kernel(%arg0: i32, %arg1: memref<8x1024xbf16, #tpu.memory_space<vmem>>, %arg2: memref<1024x128xbf16, #tpu.memory_space<vmem>>, %arg3: memref<1x128xf32, #tpu.memory_space<vmem>>, %arg4: memref<8x128xf32, #tpu.memory_space<vmem>>) attributes {dimension_semantics = [#tpu.dimension_semantics<parallel>], iteration_bounds = array<i64: 1>, scalar_prefetch = 0 : i64, scratch_operands = 0 : i64, tpu.core_type = #tpu.core_type<tc>, window_params = [{transform_indices = @transform_0, window_bounds = array<i64: 8, 1024>}, {pipeline_mode = #tpu.pipeline_mode<synchronous>, transform_indices = @transform_1, window_bounds = array<i64: 1024, 128>}, {pipeline_mode = #tpu.pipeline_mode<synchronous>, transform_indices = @transform_2, window_bounds = array<i64: 1, 128>}, {transform_indices = @transform_3, window_bounds = array<i64: 8, 128>}]} {
    %c0 = arith.constant 0 : index
    %c0_0 = arith.constant 0 : index
    %0 = vector.load %arg1[%c0, %c0_0] : memref<8x1024xbf16, #tpu.memory_space<vmem>>, vector<8x1024xbf16>
    %c0_1 = arith.constant 0 : index
    %c0_2 = arith.constant 0 : index
    %1 = vector.load %arg2[%c0_1, %c0_2] : memref<1024x128xbf16, #tpu.memory_space<vmem>>, vector<1024x128xbf16>
    %cst = arith.constant dense<0.000000e+00> : vector<8x128xf32>
    %2 = tpu.matmul %0, %1, %cst {dimension_numbers = #tpu.dot_dimension_numbers<[1], [0], [0], [1], [0, 0, 1, 1], [], []>} : vector<8x1024xbf16>, vector<1024x128xbf16>, vector<8x128xf32> -> vector<8x128xf32>
    %c0_3 = arith.constant 0 : index
    %c0_4 = arith.constant 0 : index
    %3 = vector.load %arg3[%c0_3, %c0_4] : memref<1x128xf32, #tpu.memory_space<vmem>>, vector<1x128xf32>
    %4 = vector.broadcast %3 : vector<1x128xf32> to vector<8x128xf32>
    %5 = arith.addf %2, %4 : vector<8x128xf32>
    %c0_5 = arith.constant 0 : index
    %c0_6 = arith.constant 0 : index
    %6 = vector.load %arg4[%c0_5, %c0_6] : memref<8x128xf32, #tpu.memory_space<vmem>>, vector<8x128xf32>
    tpu.vector_store %arg4[%c0_5, %c0_6], %5 {strides = array<i32>} : memref<8x128xf32, #tpu.memory_space<vmem>>, vector<8x128xf32>,
    return
  }
  func.func @transform_0(%arg0: i32) -> (i32, i32) {
    %c0_i32 = arith.constant 0 : i32
    %c0_i32_0 = arith.constant 0 : i32
    return %arg0, %c0_i32 : i32, i32
  }
  func.func @transform_1(%arg0: i32) -> (i32, i32) {
    %c0_i32 = arith.constant 0 : i32
    %c0_i32_0 = arith.constant 0 : i32
    %c0_i32_1 = arith.constant 0 : i32
    return %c0_i32, %c0_i32_0 : i32, i32
  }
  func.func @transform_2(%arg0: i32) -> (i32, i32) {
    %c0_i32 = arith.constant 0 : i32
    %c0_i32_0 = arith.constant 0 : i32
    %c0_i32_1 = arith.constant 0 : i32
    return %c0_i32, %c0_i32_0 : i32, i32
  }
  func.func @transform_3(%arg0: i32) -> (i32, i32) {
    %c0_i32 = arith.constant 0 : i32
    %c0_i32_0 = arith.constant 0 : i32
    return %arg0, %c0_i32 : i32, i32
  }
}

</mosaic_0001>

<bundles_post_ra>
// kernel: forward.1
= control target key start
LH: loop header
LB: loop body
LE: loop exit
PB: predicated region body
PF: predicated region fallthrough
CT: control target
= control target key end

     0   :  { %8 = vsyncpa [#allocation3], 0  ;;  %s1151_s0 = inlined_call_operand.vmem [shape: bf16[2,1024], index: 0, kind: input, shape index: {}]   ;;  %s1152_s1 = inlined_call_operand.hbm [shape: bf16[1024,128], index: 1, kind: input, shape index: {}]   ;;  %s1153_s2 = inlined_call_operand.vmem [shape: f32[1,128], index: 2, kind: input, shape index: {}]   ;;  %s1154_s3 = inlined_call_operand.hbm [shape: f32[2,128], index: 3, kind: output, shape index: {}]  }
   0x1   :  { %9 = vsyncpa [#allocation4], 0  ;;  %s1085_s12 = smov [#allocation2]  }
   0x2   :  { %s17_s13 = sshll.u32 %s1085_s12, 4  ;;  %s18_s13 = int_to_ptr.vmem [resolvable:$true] %s17_s13 }
   0x3   :  { %s1049_s14 = scalar_lea.vmem %s18_s13, 8192  ;;  %p1054_p1 = scmp.lt.s32.totalorder %s18_s13, %s18_s13 }
   0x4   :  { %p1050_p0 = scmp.ne.s32.totalorder %s18_s13, %s1049_s14  ;;  %p1055_p2 = scmp.lt.s32.totalorder %s1049_s14, %s1049_s14 }
   0x6   :  { %p1056_p3 = por %p1055_p2, %p1054_p1 }
   0x8   :  { %p1057_p4 = pnand %p1056_p3, %p1050_p0 }
   0xa   :  { %1060 = shalt.err (!%p1057_p4)
}
   0xb   :  { %s1086_s15 = smov 64   ;;  %s1087_s16 = smov 4  }
   0xc   :  { %23 = dma.hbm_to_vmem [thread:$0]  %s1152_s1, 8192, %s18_s13, [#allocation3], %s1086_s15, %s1086_s15, %s1087_s16  }
   0xd   :  { %1081 = dma.done.wait [#allocation3], 8192  }
   0xe   :  { %1082 = vsyncadd [#allocation3], 4294959104  ;;  %v971_v0 = vld [vmem:[#allocation2 + $0x78] sm:$0xff]   ;;  %v975_v4 = vld [vmem:[#allocation2 + $0x70] sm:$0xff]   ;;  %v1088_v24 = vmov 1966171168   ;;  %v180_v26 = vlaneseq }
   0xf   :  { %v972_v1 = vld [vmem:[#allocation2 + $0xf8] sm:$0xff]   ;;  %876 = vmatprep.subr.bf16.mxu0 %v971_v0  ;;  %v976_v5 = vld [vmem:[#allocation2 + $0xf0] sm:$0xff]   ;;  %v979_v8 = vld [vmem:[#allocation2 + $0x68] sm:$0xff]   ;;  %v178_v25 = vunpack.c.l.s4 %v1088_v24 }
  0x10   :  { %v973_v2 = vld [vmem:[#allocation2 + $0x38] sm:$0xff]   ;;  %898 = vmatprep.subr.bf16.mxu1 %v972_v1  ;;  %v977_v6 = vld [vmem:[#allocation2 + $0x30] sm:$0xff]   ;;  %v980_v9 = vld [vmem:[#allocation2 + $0xe8] sm:$0xff]   ;;  %v181_v32 = vshrl.u32 %v180_v26, 7 }
  0x11   :  { %v974_v3 = vld [vmem:[#allocation2 + $0xb8] sm:$0xff]   ;;  %877 = vmatpush3.bf16.msra.mxu0 %v973_v2  ;;  %v978_v7 = vld [vmem:[#allocation2 + $0xb0] sm:$0xff]   ;;  %v981_v10 = vld [vmem:[#allocation2 + $0x28] sm:$0xff]   ;;  %v179_v31 = vunpack.c.0.s8 %v178_v25 }
  0x12   :  { %899 = vmatpush3.bf16.msra.mxu1 %v974_v3  ;;  %878 = vmatprep.subr.bf16.mxu0 %v975_v4  ;;  %v982_v11 = vld [vmem:[#allocation2 + $0xa8] sm:$0xff]   ;;  %v983_v12 = vld [vmem:[#allocation2 + $0x60] sm:$0xff]   ;;  %v987_v16 = vld [vmem:[#allocation2 + $0x58] sm:$0xff]  }
  0x13   :  { %900 = vmatprep.subr.bf16.mxu1 %v976_v5  ;;  %v984_v13 = vld [vmem:[#allocation2 + $0xe0] sm:$0xff]   ;;  %v988_v17 = vld [vmem:[#allocation2 + $0xd8] sm:$0xff]   ;;  %v991_v20 = vld [vmem:[#allocation2 + $0x50] sm:$0xff]   ;;  %v1115_v37 = vsub.s32 %v179_v31, %v181_v32 }
  0x14   :  { %v985_v14 = vld [vmem:[#allocation2 + $0x20] sm:$0xff]   ;;  %v989_v18 = vld [vmem:[#allocation2 + $0x18] sm:$0xff]   ;;  %v992_v21 = vld [vmem:[#allocation2 + $0xd0] sm:$0xff]  }
  0x15   :  { %879 = vmatpush3.bf16.msra.mxu0 %v977_v6  ;;  %v986_v15 = vld [vmem:[#allocation2 + $0xa0] sm:$0xff]   ;;  %v990_v19 = vld [vmem:[#allocation2 + $0x98] sm:$0xff]   ;;  %v993_v22 = vld [vmem:[#allocation2 + $0x10] sm:$0xff]  }
  0x16   :  { %901 = vmatpush3.bf16.msra.mxu1 %v978_v7  ;;  %880 = vmatprep.subr.bf16.mxu0 %v979_v8  ;;  %v994_v23 = vld [vmem:[#allocation2 + $0x90] sm:$0xff]   ;;  %v995_v27 = vld [vmem:[#allocation2 + $0x48] sm:$0xff]   ;;  %v999_v33 = vld [vmem:[#allocation2 + $0x40] sm:$0xff]  }
  0x17   :  { %902 = vmatprep.subr.bf16.mxu1 %v980_v9  ;;  %v996_v28 = vld [vmem:[#allocation2 + $0xc8] sm:$0xff]   ;;  %v1000_v34 = vld [vmem:[#allocation2 + $0xc0] sm:$0xff]   ;;  %v1006_v40 = vld [vmem:[%s1151_s0 + $0x10] ss:$8 sps:$4 sm:$0xff]  }
  0x18   :  { %v997_v29 = vld [vmem:[#allocation2 + $0x8] sm:$0xff]   ;;  %v1001_v35 = vld [vmem:[#allocation2] sm:$0xff]   ;;  %v1008_v41 = vld [vmem:[%s1151_s0 + $0x14] ss:$8 sps:$4 sm:$0xff]   ;;  %v197_v45 = vrot.slane %v1006_v40, %v1115_v37 }
  0x19   :  { %881 = vmatpush3.bf16.msra.mxu0 %v981_v10  ;;  %v998_v30 = vld [vmem:[#allocation2 + $0x88] sm:$0xff]   ;;  %v1002_v36 = vld [vmem:[#allocation2 + $0x80] sm:$0xff]   ;;  %v1009_v43 = vld [vmem:[#allocation2 + $0x178] sm:$0xff]   ;;  %v1135_v47 = vrot.slane %v1008_v41, %v1115_v37 }
  0x1a   :  { %903 = vmatpush3.bf16.msra.mxu1 %v982_v11  ;;  %882 = vmatprep.subr.bf16.mxu0 %v983_v12  ;;  %v1003_v38 = vld [vmem:[%s1151_s0] ss:$8 sps:$4 sm:$0xff]   ;;  %v1005_v39 = vld [vmem:[%s1151_s0 + $0x4] ss:$8 sps:$4 sm:$0xff]   ;;  %v1010_v46 = vld [vmem:[#allocation2 + $0x1f8] sm:$0xff]  }
  0x1b   :  { %904 = vmatprep.subr.bf16.mxu1 %v984_v13  ;;  %v183_v42 = vrot.slane %v1003_v38, %v1115_v37  ;;  %v1131_v44 = vrot.slane %v1005_v39, %v1115_v37  ;;  %v1011_v53 = vld [vmem:[#allocation2 + $0x138] sm:$0xff]   ;;  %v1013_v55 = vld [vmem:[#allocation2 + $0x170] sm:$0xff]   ;;  %v1017_v62 = vld [vmem:[#allocation2 + $0x168] sm:$0xff]  }
  0x1c   :  { %v1012_v58 = vld [vmem:[#allocation2 + $0x1b8] sm:$0xff]   ;;  %v1014_v59 = vld [vmem:[#allocation2 + $0x1f0] sm:$0xff]   ;;  %v1018_v0 = vld [vmem:[#allocation2 + $0x1e8] sm:$0xff]  }
  0x1d   :  { %883 = vmatpush3.bf16.msra.mxu0 %v985_v14  ;;  %v206_v48 = vcombine.high %v183_v42, %v197_v45  ;;  %v205_v49 = vcombine.low %v183_v42, %v197_v45  ;;  %v208_v50 = vcombine.high %v1131_v44, %v1135_v47  ;;  %v1015_v61 = vld [vmem:[#allocation2 + $0x130] sm:$0xff]   ;;  %v1019_v1 = vld [vmem:[#allocation2 + $0x128] sm:$0xff]   ;;  %v1021_v2 = vld [vmem:[#allocation2 + $0x160] sm:$0xff]  }
  0x1e   :  { %905 = vmatpush3.bf16.msra.mxu1 %v986_v15  ;;  %884 = vmatprep.subr.bf16.mxu0 %v987_v16  ;;  %v1016_v63 = vld [vmem:[#allocation2 + $0x1b0] sm:$0xff]   ;;  %v1020_v3 = vld [vmem:[#allocation2 + $0x1a8] sm:$0xff]   ;;  %v1022_v4 = vld [vmem:[#allocation2 + $0x1e0] sm:$0xff]  }
  0x1f   :  { %906 = vmatprep.subr.bf16.mxu1 %v988_v17  ;;  %v229_v51 = vrot.slane %v206_v48, %v1115_v37  ;;  %v215_v52 = vrot.slane %v205_v49, %v1115_v37  ;;  %v236_v54 = vrot.slane %v208_v50, %v1115_v37  ;;  %v1023_v5 = vld [vmem:[#allocation2 + $0x120] sm:$0xff]   ;;  %v1025_v6 = vld [vmem:[#allocation2 + $0x158] sm:$0xff]   ;;  %v1029_v10 = vld [vmem:[#allocation2 + $0x150] sm:$0xff]  }
  0x20   :  { %v1024_v7 = vld [vmem:[#allocation2 + $0x1a0] sm:$0xff]   ;;  %v1026_v8 = vld [vmem:[#allocation2 + $0x1d8] sm:$0xff]   ;;  %v1030_v12 = vld [vmem:[#allocation2 + $0x1d0] sm:$0xff]  }
  0x21   :  { %885 = vmatpush3.bf16.msra.mxu0 %v989_v18  ;;  %665 = vmatprep.mubr.bf16.mxu0 %v229_v51  ;;  %v239_v56 = vcombine.high %v229_v51, %v229_v51  ;;  %v237_v57 = vcombine.high %v215_v52, %v215_v52  ;;  %v240_v60 = vcombine.high %v236_v54, %v236_v54  ;;  %v1027_v9 = vld [vmem:[#allocation2 + $0x118] sm:$0xff]   ;;  %v1031_v13 = vld [vmem:[#allocation2 + $0x110] sm:$0xff]   ;;  %v1033_v14 = vld [vmem:[#allocation2 + $0x148] sm:$0xff]  }
  0x22   :  { %907 = vmatpush3.bf16.msra.mxu1 %v990_v19  ;;  %886 = vmatprep.subr.bf16.mxu0 %v991_v20  ;;  %v1028_v11 = vld [vmem:[#allocation2 + $0x198] sm:$0xff]   ;;  %v1032_v15 = vld [vmem:[#allocation2 + $0x190] sm:$0xff]   ;;  %v1034_v16 = vld [vmem:[#allocation2 + $0x1c8] sm:$0xff]   ;;  %v207_v19 = vcombine.low %v1131_v44, %v1135_v47 }
  0x23   :  { %908 = vmatprep.subr.bf16.mxu1 %v992_v21  ;;  %705 = vmatprep.mubr.bf16.mxu1 %v239_v56  ;;  %v1035_v17 = vld [vmem:[#allocation2 + $0x108] sm:$0xff]   ;;  %v1037_v18 = vld [vmem:[#allocation2 + $0x140] sm:$0xff]  }
  0x24   :  { %v1036_v20 = vld [vmem:[#allocation2 + $0x188] sm:$0xff]   ;;  %v1038_v21 = vld [vmem:[#allocation2 + $0x1c0] sm:$0xff]  }
  0x25   :  { %887 = vmatpush3.bf16.msra.mxu0 %v993_v22  ;;  %v1039_v22 = vld [vmem:[#allocation2 + $0x100] sm:$0xff]  }
  0x26   :  { %909 = vmatpush3.bf16.msra.mxu1 %v994_v23  ;;  %888 = vmatprep.subr.bf16.mxu0 %v995_v27  ;;  %v222_v23 = vrot.slane %v207_v19, %v1115_v37  ;;  %v1040_v24 = vld [vmem:[#allocation2 + $0x180] sm:$0xff]  }
  0x27   :  { %910 = vmatprep.subr.bf16.mxu1 %v996_v28 }
  0x28   :  { %v238_v25 = vcombine.high %v222_v23, %v222_v23 }
  0x29   :  { %889 = vmatpush3.bf16.msra.mxu0 %v997_v29 }
  0x2a   :  { %911 = vmatpush3.bf16.msra.mxu1 %v998_v30  ;;  %890 = vmatprep.subr.bf16.mxu0 %v999_v33 }
  0x2b   :  { %912 = vmatprep.subr.bf16.mxu1 %v1000_v34 }
  0x2d   :  { %891 = vmatpush3.bf16.msra.mxu0 %v1001_v35  ;;  %v811_v35 = vld [vmem:[%s1153_s2] ss:$0 sm:$0xff] }
  0x2e   :  { %913 = vmatpush3.bf16.msra.mxu1 %v1002_v36  ;;  %920 = vmatprep.subr.bf16.mxu0 %v1009_v43 }
  0x2f   :  { %942 = vmatprep.subr.bf16.mxu1 %v1010_v46 }
  0x30   :  { %666 = vmatmul.mubr.bf16.vlgmr.msra.gmra.mxu0 %v215_v52 }
  0x31   :  { %921 = vmatpush3.bf16.msra.mxu0 %v1011_v53  ;;  %706 = vmatmul.mubr.bf16.vlgmr.msra.gmra.mxu1 %v237_v57 }
  0x32   :  { %922 = vmatprep.subr.bf16.mxu0 %v1013_v55  ;;  %943 = vmatpush3.bf16.msra.mxu1 %v1012_v58 }
  0x33   :  { %745 = vmatprep.mubr.bf16.mxu0 %v236_v54  ;;  %944 = vmatprep.subr.bf16.mxu1 %v1014_v59 }
  0x34   :  { %785 = vmatprep.mubr.bf16.mxu1 %v240_v60 }
  0x35   :  { %923 = vmatpush3.bf16.msra.mxu0 %v1015_v61 }
  0x36   :  { %924 = vmatprep.subr.bf16.mxu0 %v1017_v62  ;;  %945 = vmatpush3.bf16.msra.mxu1 %v1016_v63 }
  0x37   :  { %946 = vmatprep.subr.bf16.mxu1 %v1018_v0 }
  0x39   :  { %925 = vmatpush3.bf16.msra.mxu0 %v1019_v1 }
  0x3a   :  { %926 = vmatprep.subr.bf16.mxu0 %v1021_v2  ;;  %947 = vmatpush3.bf16.msra.mxu1 %v1020_v3 }
  0x3b   :  { %948 = vmatprep.subr.bf16.mxu1 %v1022_v4 }
  0x3d   :  { %927 = vmatpush3.bf16.msra.mxu0 %v1023_v5 }
  0x3e   :  { %928 = vmatprep.subr.bf16.mxu0 %v1025_v6  ;;  %949 = vmatpush3.bf16.msra.mxu1 %v1024_v7 }
  0x3f   :  { %950 = vmatprep.subr.bf16.mxu1 %v1026_v8 }
  0x41   :  { %929 = vmatpush3.bf16.msra.mxu0 %v1027_v9 }
  0x42   :  { %930 = vmatprep.subr.bf16.mxu0 %v1029_v10  ;;  %951 = vmatpush3.bf16.msra.mxu1 %v1028_v11 }
  0x43   :  { %952 = vmatprep.subr.bf16.mxu1 %v1030_v12 }
  0x45   :  { %931 = vmatpush3.bf16.msra.mxu0 %v1031_v13 }
  0x46   :  { %932 = vmatprep.subr.bf16.mxu0 %v1033_v14  ;;  %953 = vmatpush3.bf16.msra.mxu1 %v1032_v15 }
  0x47   :  { %954 = vmatprep.subr.bf16.mxu1 %v1034_v16 }
  0x49   :  { %933 = vmatpush3.bf16.msra.mxu0 %v1035_v17 }
  0x4a   :  { %934 = vmatprep.subr.bf16.mxu0 %v1037_v18  ;;  %955 = vmatpush3.bf16.msra.mxu1 %v1036_v20 }
  0x4b   :  { %956 = vmatprep.subr.bf16.mxu1 %v1038_v21 }
  0x4d   :  { %935 = vmatpush3.bf16.msra.mxu0 %v1039_v22 }
  0x4e   :  { %957 = vmatpush3.bf16.msra.mxu1 %v1040_v24 }
  0x50   :  { %746 = vmatmul.mubr.bf16.vlgmr.msra.gmra.mxu0 %v222_v23 }
  0x51   :  { %786 = vmatmul.mubr.bf16.vlgmr.msra.gmra.mxu1 %v238_v25 }
  0xf0   :  { %v892_v26 = vpop.f32.mrf.mxu0 }
  0xf1   :  { %v914_v27 = vpop.f32.mrf.mxu1 }
  0xf2   :  { %v893_v28 = vpop.f32.mrf.mxu0 }
  0xf3   :  { %v915_v29 = vpop.f32.mrf.mxu1  ;;  %v894_v34 = vadd.f32 %v893_v28, %v892_v26 }
  0xf4   :  { %v895_v30 = vpop.f32.mrf.mxu0  ;;  %v916_v37 = vadd.f32 %v915_v29, %v914_v27 }
  0xf5   :  { %v917_v31 = vpop.f32.mrf.mxu1  ;;  %v668_v36 = vadd.f32 %v894_v34, %v811_v35 }
  0xf6   :  { %v896_v32 = vpop.f32.mrf.mxu0 }
  0xf7   :  { %v918_v33 = vpop.f32.mrf.mxu1  ;;  %v708_v41 = vadd.f32 %v916_v37, %v668_v36 }
 0x110   :  { %v936_v38 = vpop.f32.mrf.mxu0 }
 0x111   :  { %v958_v39 = vpop.f32.mrf.mxu1 }
 0x112   :  { %v937_v40 = vpop.f32.mrf.mxu0 }
 0x113   :  { %v938_v42 = vadd.f32 %v937_v40, %v936_v38  ;;  %v959_v43 = vpop.f32.mrf.mxu1 }
 0x114   :  { %v939_v44 = vpop.f32.mrf.mxu0  ;;  %v960_v46 = vadd.f32 %v959_v43, %v958_v39 }
 0x115   :  { %v748_v45 = vadd.f32 %v938_v42, %v708_v41  ;;  %v961_v47 = vpop.f32.mrf.mxu1 }
 0x116   :  { %v940_v48 = vpop.f32.mrf.mxu0 }
 0x117   :  { %v788_v49 = vadd.f32 %v960_v46, %v748_v45  ;;  %v962_v50 = vpop.f32.mrf.mxu1 }
 0x119   :  { %793 = vst [vmem:[#allocation5] sm:$0xff] %v788_v49 }
 0x11a   :  { %798 = vsyncadd [#allocation4], 96  ;;  %s1089_s27 = smov [#allocation5]  }
 0x11b   :  { %s799_s28 = sshll.u32 %s1089_s27, 4  ;;  %s800_s28 = int_to_ptr.vmem [resolvable:$true] %s799_s28 }
 0x11c   :  { %s1061_s2 = scalar_lea.vmem %s800_s28, 32  ;;  %s1065_s29 = scalar_lea.vmem %s800_s28, 128 }
 0x11d   :  { %p1062_p5 = scmp.ne.s32.totalorder %s800_s28, %s1061_s2  ;;  %p1066_p6 = scmp.lt.s32.totalorder %s800_s28, %s800_s28 }
 0x11e   :  { %p1067_p7 = scmp.lt.s32.totalorder %s1065_s29, %s1061_s2 }
 0x120   :  { %p1068_p8 = por %p1067_p7, %p1066_p6 }
 0x122   :  { %p1069_p9 = pnand %p1068_p8, %p1062_p5 }
 0x124   :  { %1072 = shalt.err (!%p1069_p9)
}
 0x125   :  { %s1090_s30 = smov 32   ;;  %s1091_s4 = smov 2  }
 0x126   :  { %805 = dma.vmem_to_hbm [thread:$0]  %s800_s28, 32, %s1154_s3, [#allocation4], %s1090_s30, %s1090_s30, %s1091_s4  }
 0x127   :  { %1083 = dma.done.wait [#allocation4], 128  }
 0x128   :  { %1084 = vsyncadd [#allocation4], 4294967168 }
 0x129   :  { %809 = vsyncpa [#allocation3], 1 }
 0x12a   :  { %810 = vsyncpa [#allocation4], 1 }

</bundles_post_ra>
